<compile_context>
chip_gen: v7x
topology: tpu7x:2x2x1
jax: 0.10.0
libtpu: 0.0.40
codegen_flags: <defaults>
</compile_context>

<pallas_src>
import jax
import jax.numpy as jnp
from jax.experimental import pallas as pl
from jax.experimental.pallas import tpu as pltpu


def _round_up(n: int, m: int) -> int:
    return ((n + m - 1) // m) * m


def mlp_kernel(x_ref, w1_ref, b1_ref, w2_ref, b2_ref, w3_ref, b3_ref, o_ref):
    # Layer 1: Linear + tanh.  K = true D_in; hidden lanes >= 40 see 0-weights + 0-bias,
    # so tanh(0) = 0 there and they never contribute downstream.
    h1 = jnp.tanh(
        jnp.dot(x_ref[...], w1_ref[...], preferred_element_type=jnp.float32) + b1_ref[...]
    )
    # Layer 2: Linear + relu (padded lanes stay 0 through relu).
    # Note: h1 (tb x 128) + h2 (tb x 256) in f32 is vreg-heavy at tb=128; spills at this size
    # are cheap — only split the N=256 dot in halves if a bundle dump shows ld/st saturation.
    h2 = jnp.maximum(
        jnp.dot(h1, w2_ref[...], preferred_element_type=jnp.float32) + b2_ref[...], 0.0
    )
    # Layer 3: Linear, written straight to the true-width (D_out) output block.
    out = jnp.dot(h2, w3_ref[...], preferred_element_type=jnp.float32) + b3_ref[...]
    o_ref[...] = out.astype(o_ref.dtype)


def mlp_forward(x, params, *, batch_tile=128, core_parallel=False, vmem_limit_bytes=None):
    """x: [B, D_in] f32 (unpadded).  params: (w1,b1,w2,b2,w3,b3) with hidden dims lane-padded.

    Returns [B, D_out] f32 (D_out = w3.shape[1], unpadded)."""
    w1, b1, w2, b2, w3, b3 = params
    B, d_in = x.shape
    assert w1.shape[0] == d_in
    h1_p, h2_p = w1.shape[1], w2.shape[1]
    d_out = w3.shape[1]

    tb = min(_round_up(batch_tile, 8), _round_up(max(B, 1), 8))
    n_tiles = pl.cdiv(B, tb)

    # Constant index_map -> fetched once, stays resident in VMEM across all grid steps.
    resident = lambda a: pl.BlockSpec(a.shape, lambda i: (0, 0))

    flops = 2 * B * (d_in * h1_p + h1_p * h2_p + h2_p * d_out)
    bytes_accessed = 4 * (
        x.size + w1.size + b1.size + w2.size + b2.size + w3.size + b3.size + B * d_out
    )

    dim_sem = (pltpu.CORE_PARALLEL,) if core_parallel else ("arbitrary",)

    return pl.pallas_call(
        mlp_kernel,
        out_shape=jax.ShapeDtypeStruct((B, d_out), jnp.float32),
        grid=(n_tiles,),
        in_specs=[
            pl.BlockSpec((tb, d_in), lambda i: (i, 0)),   # per-step x tile (ragged last block OK)
            resident(w1), resident(b1),
            resident(w2), resident(b2),
            resident(w3), resident(b3),
        ],
        out_specs=pl.BlockSpec((tb, d_out), lambda i: (i, 0)),  # direct unpadded output store
        compiler_params=pltpu.CompilerParams(
            dimension_semantics=dim_sem,
            vmem_limit_bytes=vmem_limit_bytes,
        ),
        cost_estimate=pl.CostEstimate(
            flops=flops,
            transcendentals=B * h1_p,  # tanh
            bytes_accessed=bytes_accessed,
        ),
    )(x, w1, b1, w2, b2, w3, b3)


def xavier_uniform(key, fan_in, fan_out):
    # matches torch.nn.init.xavier_uniform_ bound; stored as [in, out]
    bound = jnp.sqrt(6.0 / (fan_in + fan_out))
    return jax.random.uniform(key, (fan_in, fan_out), jnp.float32, -bound, bound)


def init_params(key, input_shape, in_nn, output_shape, pad_to=128):
    """Lane-pad ONLY the hidden dims (40->128, 150->256).  The kernel-facing input width
    (layer-1 K) and output width (layer-3 N) keep their true sizes so the wrapper never pads x
    nor slices the output.  Real weights occupy the top-left block of each padded weight;
    padded rows/cols are 0.  Real bias entries are 0.01 (m.bias.data.fill_(0.01)); padded 0."""
    dims = [input_shape] + list(in_nn) + [output_shape]
    pdims = [dims[0]] + [_round_up(d, pad_to) for d in dims[1:-1]] + [dims[-1]]
    params = []
    keys = jax.random.split(key, len(dims) - 1)
    for k, fi, fo, fip, fop in zip(keys, dims[:-1], dims[1:], pdims[:-1], pdims[1:]):
        w = jnp.zeros((fip, fop), jnp.float32).at[:fi, :fo].set(xavier_uniform(k, fi, fo))
        b = jnp.zeros((1, fop), jnp.float32).at[:, :fo].set(0.01)
        params.extend([w, b])
    return tuple(params)


if __name__ == "__main__":
    key = jax.random.PRNGKey(0)
    B, D_in, D_out = 200, 32, 8      # B deliberately not a tile multiple (exercises ragged block)
    in_nn = [40, 150]                # hidden sizes; tanh / relu activations baked into the kernel
    H1, H2 = in_nn

    k_x, k_p = jax.random.split(key)
    x = jax.random.normal(k_x, (B, D_in), jnp.float32)
    params = init_params(k_p, D_in, in_nn, D_out)

    out = mlp_forward(x, params, batch_tile=128)   # core_parallel=True on v7x for a real TC split
    jax.block_until_ready(out)

    # plain-JAX reference on the unpadded (real) slices of the same params
    w1, b1, w2, b2, w3, b3 = params
    ref = jnp.tanh(x @ w1[:D_in, :H1] + b1[:, :H1])
    ref = jnp.maximum(ref @ w2[:H1, :H2] + b2[:, :H2], 0.0)
    ref = ref @ w3[:H2, :D_out] + b3[:, :D_out]

    assert out.shape == (B, D_out)
    assert jnp.allclose(out, ref, atol=1e-4, rtol=1e-4), float(jnp.max(jnp.abs(out - ref)))

    print("KERNEL_OK")
</pallas_src>

<mosaic_0001>
module attributes {stable_mosaic.version = 11 : i64} {
  func.func @mlp_kernel(%arg0: i32, %arg1: memref<128x32xf32, #tpu.memory_space<vmem>>, %arg2: memref<32x128xf32, #tpu.memory_space<vmem>>, %arg3: memref<1x128xf32, #tpu.memory_space<vmem>>, %arg4: memref<128x256xf32, #tpu.memory_space<vmem>>, %arg5: memref<1x256xf32, #tpu.memory_space<vmem>>, %arg6: memref<256x8xf32, #tpu.memory_space<vmem>>, %arg7: memref<1x8xf32, #tpu.memory_space<vmem>>, %arg8: memref<128x8xf32, #tpu.memory_space<vmem>>) attributes {dimension_semantics = [#tpu.dimension_semantics<arbitrary>], iteration_bounds = array<i64: 2>, scalar_prefetch = 0 : i64, scratch_operands = 0 : i64, tpu.core_type = #tpu.core_type<tc>, window_params = [{transform_indices = @transform_0, window_bounds = array<i64: 128, 32>}, {pipeline_mode = #tpu.pipeline_mode<synchronous>, transform_indices = @transform_1, window_bounds = array<i64: 32, 128>}, {pipeline_mode = #tpu.pipeline_mode<synchronous>, transform_indices = @transform_2, window_bounds = array<i64: 1, 128>}, {pipeline_mode = #tpu.pipeline_mode<synchronous>, transform_indices = @transform_3, window_bounds = array<i64: 128, 256>}, {pipeline_mode = #tpu.pipeline_mode<synchronous>, transform_indices = @transform_4, window_bounds = array<i64: 1, 256>}, {pipeline_mode = #tpu.pipeline_mode<synchronous>, transform_indices = @transform_5, window_bounds = array<i64: 256, 8>}, {pipeline_mode = #tpu.pipeline_mode<synchronous>, transform_indices = @transform_6, window_bounds = array<i64: 1, 8>}, {transform_indices = @transform_7, window_bounds = array<i64: 128, 8>}]} {
    %c0 = arith.constant 0 : index
    %c0_0 = arith.constant 0 : index
    %0 = vector.load %arg1[%c0, %c0_0] : memref<128x32xf32, #tpu.memory_space<vmem>>, vector<128x32xf32>
    %c0_1 = arith.constant 0 : index
    %c0_2 = arith.constant 0 : index
    %1 = vector.load %arg2[%c0_1, %c0_2] : memref<32x128xf32, #tpu.memory_space<vmem>>, vector<32x128xf32>
    %cst = arith.constant dense<0.000000e+00> : vector<128x128xf32>
    %2 = tpu.matmul %0, %1, %cst {dimension_numbers = #tpu.dot_dimension_numbers<[1], [0], [0], [1], [0, 0, 1, 1], [], []>} : vector<128x32xf32>, vector<32x128xf32>, vector<128x128xf32> -> vector<128x128xf32>
    %c0_3 = arith.constant 0 : index
    %c0_4 = arith.constant 0 : index
    %3 = vector.load %arg3[%c0_3, %c0_4] : memref<1x128xf32, #tpu.memory_space<vmem>>, vector<1x128xf32>
    %4 = vector.broadcast %3 : vector<1x128xf32> to vector<128x128xf32>
    %5 = arith.addf %2, %4 : vector<128x128xf32>
    %6 = math.tanh %5 : vector<128x128xf32>
    %c0_5 = arith.constant 0 : index
    %c0_6 = arith.constant 0 : index
    %7 = vector.load %arg4[%c0_5, %c0_6] : memref<128x256xf32, #tpu.memory_space<vmem>>, vector<128x256xf32>
    %cst_7 = arith.constant dense<0.000000e+00> : vector<128x256xf32>
    %8 = tpu.matmul %6, %7, %cst_7 {dimension_numbers = #tpu.dot_dimension_numbers<[1], [0], [0], [1], [0, 0, 1, 1], [], []>} : vector<128x128xf32>, vector<128x256xf32>, vector<128x256xf32> -> vector<128x256xf32>
    %c0_8 = arith.constant 0 : index
    %c0_9 = arith.constant 0 : index
    %9 = vector.load %arg5[%c0_8, %c0_9] : memref<1x256xf32, #tpu.memory_space<vmem>>, vector<1x256xf32>
    %10 = vector.broadcast %9 : vector<1x256xf32> to vector<128x256xf32>
    %11 = arith.addf %8, %10 : vector<128x256xf32>
    %cst_10 = arith.constant 0.000000e+00 : f32
    %12 = vector.broadcast %cst_10 : f32 to vector<128x256xf32>
    %13 = arith.maximumf %11, %12 : vector<128x256xf32>
    %c0_11 = arith.constant 0 : index
    %c0_12 = arith.constant 0 : index
    %14 = vector.load %arg6[%c0_11, %c0_12] : memref<256x8xf32, #tpu.memory_space<vmem>>, vector<256x8xf32>
    %cst_13 = arith.constant dense<0.000000e+00> : vector<128x8xf32>
    %15 = tpu.matmul %13, %14, %cst_13 {dimension_numbers = #tpu.dot_dimension_numbers<[1], [0], [0], [1], [0, 0, 1, 1], [], []>} : vector<128x256xf32>, vector<256x8xf32>, vector<128x8xf32> -> vector<128x8xf32>
    %c0_14 = arith.constant 0 : index
    %c0_15 = arith.constant 0 : index
    %16 = vector.load %arg7[%c0_14, %c0_15] : memref<1x8xf32, #tpu.memory_space<vmem>>, vector<1x8xf32>
    %17 = vector.broadcast %16 : vector<1x8xf32> to vector<128x8xf32>
    %18 = arith.addf %15, %17 : vector<128x8xf32>
    %c0_16 = arith.constant 0 : index
    %c0_17 = arith.constant 0 : index
    %19 = vector.load %arg8[%c0_16, %c0_17] : memref<128x8xf32, #tpu.memory_space<vmem>>, vector<128x8xf32>
    tpu.vector_store %arg8[%c0_16, %c0_17], %18 {strides = array<i32>} : memref<128x8xf32, #tpu.memory_space<vmem>>, vector<128x8xf32>,
    return
  }
  func.func @transform_0(%arg0: i32) -> (i32, i32) {
    %c0_i32 = arith.constant 0 : i32
    %c0_i32_0 = arith.constant 0 : i32
    return %arg0, %c0_i32 : i32, i32
  }
  func.func @transform_1(%arg0: i32) -> (i32, i32) {
    %c0_i32 = arith.constant 0 : i32
    %c0_i32_0 = arith.constant 0 : i32
    %c0_i32_1 = arith.constant 0 : i32
    return %c0_i32, %c0_i32_0 : i32, i32
  }
  func.func @transform_2(%arg0: i32) -> (i32, i32) {
    %c0_i32 = arith.constant 0 : i32
    %c0_i32_0 = arith.constant 0 : i32
    %c0_i32_1 = arith.constant 0 : i32
    return %c0_i32, %c0_i32_0 : i32, i32
  }
  func.func @transform_3(%arg0: i32) -> (i32, i32) {
    %c0_i32 = arith.constant 0 : i32
    %c0_i32_0 = arith.constant 0 : i32
    %c0_i32_1 = arith.constant 0 : i32
    return %c0_i32, %c0_i32_0 : i32, i32
  }
  func.func @transform_4(%arg0: i32) -> (i32, i32) {
    %c0_i32 = arith.constant 0 : i32
    %c0_i32_0 = arith.constant 0 : i32
    %c0_i32_1 = arith.constant 0 : i32
    return %c0_i32, %c0_i32_0 : i32, i32
  }
  func.func @transform_5(%arg0: i32) -> (i32, i32) {
    %c0_i32 = arith.constant 0 : i32
    %c0_i32_0 = arith.constant 0 : i32
    %c0_i32_1 = arith.constant 0 : i32
    return %c0_i32, %c0_i32_0 : i32, i32
  }
  func.func @transform_6(%arg0: i32) -> (i32, i32) {
    %c0_i32 = arith.constant 0 : i32
    %c0_i32_0 = arith.constant 0 : i32
    %c0_i32_1 = arith.constant 0 : i32
    return %c0_i32, %c0_i32_0 : i32, i32
  }
  func.func @transform_7(%arg0: i32) -> (i32, i32) {
    %c0_i32 = arith.constant 0 : i32
    %c0_i32_0 = arith.constant 0 : i32
    return %arg0, %c0_i32 : i32, i32
  }
}

</mosaic_0001>

<bundles_post_ra>
// kernel: tpu_custom_call.1
= control target key start
LH: loop header
LB: loop body
LE: loop exit
PB: predicated region body
PF: predicated region fallthrough
CT: control target
= control target key end

     0   :  { %s1765_s24 = smov 0   ;;  %s1767_s25 = smov 0   ;;  %s2320_s0 = inlined_call_operand.vmem [shape: f32[200,32], index: 0, kind: input, shape index: {}]   ;;  %s2321_s1 = inlined_call_operand.vmem [shape: f32[32,128], index: 1, kind: input, shape index: {}]   ;;  %s2322_s2 = inlined_call_operand.vmem [shape: f32[1,128], index: 2, kind: input, shape index: {}]   ;;  %s2323_s3 = inlined_call_operand.vmem [shape: f32[128,256], index: 3, kind: input, shape index: {}]   ;;  %s2324_s4 = inlined_call_operand.vmem [shape: f32[1,256], index: 4, kind: input, shape index: {}]   ;;  %s2325_s5 = inlined_call_operand.vmem [shape: f32[256,8], index: 5, kind: input, shape index: {}]   ;;  %s2326_s6 = inlined_call_operand.vmem [shape: f32[1,8], index: 6, kind: input, shape index: {}]   ;;  %s2327_s7 = inlined_call_operand.vmem [shape: f32[200,8], index: 7, kind: output, shape index: {}]  }
   0x1   :  { %s1769_s26 = smov 0  }
   0x2 LB: > { %s1778_s27 = sadd.s32 4294967295, %s1690_s26   ;;  %s1780_s28 = sadd.s32 1, %s1690_s26   ;;  %s1690_s26 = sphi %s1769_s26, %s2334_s26   ;;  %s1686_s25 = sphi %s1767_s25, %s2333_s25   ;;  %s1682_s24 = sphi %s1765_s24, %s2332_s24  }
   0x3   : > { %s173_s29 = ssub.s32 %s1690_s26, %s1780_s28  ;;  %s176_s30 = sadd.s32 1, %s1686_s25 }
   0x4   : > { %p174_p0 = scmp.eq.s32.totalorder %s173_s29, 0  ;;  %p186_p1 = scmp.ne.s32.totalorder %s1686_s25, %s1682_s24 }
   0x5   : > { %p187_p2 = scmp.eq.s32.totalorder %s1778_s27, 1  ;;  %p1253_p3 = scmp.ge.s32.totalorder %s1690_s26, 1 }
   0x6   : > { %s1788_s8 = scalar_select %p174_p0, %s1686_s25, %s176_s30  }
   0x7   : > { %p1790_p4 = por %p187_p2, %p186_p1  ;;  %p246_p5 = scmp.lt.s32.totalorder %s1690_s26, 3 }
   0x9   : > { %p247_p6 = pnand %p1253_p3, %p246_p5 }
   0xa   : > { %v316_v0 = vld [vmem:[%s2321_s1] sm:$0xff] (!%p247_p6)  ;;  %v317_v1 = vld [vmem:[%s2321_s1 + $0x8] sm:$0xff] (!%p247_p6)  ;;  %v318_v2 = vld [vmem:[%s2321_s1 + $0x10] sm:$0xff] (!%p247_p6)  ;;  %s1804_s16 = sshll.u32 (!%p247_p6), %s1778_s27, 4  ;;  %vm327_vm0 = vcmask (!%p247_p6), 261120   ;;  %s278_s13 = sand.u32 (!%p247_p6), 1, %s1682_s24  }
   0xb   : > { %250 = sbr.rel (%p247_p6) target bundleno = 795 (0x31b), region = 48  ;;  %v1427_v3 = vpack.c.bf16 (!%p247_p6), %v317_v1, %v316_v0  ;;  %v319_v4 = vld [vmem:[%s2321_s1 + $0x18] sm:$0xff] (!%p247_p6)  ;;  %p286_p7 = scmp.lt.s32.totalorder (!%p247_p6), %s1804_s16, 24  ;;  %v538_v5 = vld [vmem:[%s2323_s3 + $0x8] sm:$0xff] (!%p247_p6)  ;;  %v537_v9 = vld [vmem:[%s2323_s3] sm:$0xff] (!%p247_p6)  ;;  %vm958_vm1 = vcmask (!%p247_p6), 64512  }
   0xc   : > { %v540_v6 = vld [vmem:[%s2323_s3 + $0x18] sm:$0xff] (!%p247_p6)  ;;  %v1431_v7 = vpack.c.bf16 (!%p247_p6), %v319_v4, %v318_v2  ;;  %v539_v10 = vld [vmem:[%s2323_s3 + $0x10] sm:$0xff] (!%p247_p6)  ;;  %v542_v11 = vld [vmem:[%s2323_s3 + $0x28] sm:$0xff] (!%p247_p6)  ;;  %s1254_s14 = sshll.u32 (!%p247_p6), %s278_s13, 7 }
   0xd   : > { %v1435_v8 = vpack.c.bf16 (!%p247_p6), %v540_v6, %v538_v5  ;;  %1428 = vmatprep.subr.bf16.mxu0 (!%p247_p6), %v1427_v3  ;;  %v1437_v12 = vpack.c.bf16 (!%p247_p6), %v539_v10, %v537_v9  ;;  %v544_v13 = vld [vmem:[%s2323_s3 + $0x38] sm:$0xff] (!%p247_p6)  ;;  %v541_v14 = vld [vmem:[%s2323_s3 + $0x20] sm:$0xff] (!%p247_p6)  ;;  %v543_v15 = vld [vmem:[%s2323_s3 + $0x30] sm:$0xff] (!%p247_p6)  ;;  %v1724_v5 = vmov (!%p247_p6), 0.0   ;;  %s2171_s17 = scalar_lea.vmem (!%p247_p6), [#allocation2], %s1254_s14  }
   0xe   : > { %1430 = vmatpush3.bf16.msra.mxu0 (!%p247_p6), %v1427_v3  ;;  %v1439_v16 = vpack.c.bf16 (!%p247_p6), %v544_v13, %v542_v11  ;;  %v546_v17 = vld [vmem:[%s2323_s3 + $0x48] sm:$0xff] (!%p247_p6)  ;;  %v548_v18 = vld [vmem:[%s2323_s3 + $0x58] sm:$0xff] (!%p247_p6)  ;;  %v1441_v19 = vpack.c.bf16 (!%p247_p6), %v543_v15, %v541_v14  ;;  %v545_v21 = vld [vmem:[%s2323_s3 + $0x40] sm:$0xff] (!%p247_p6)  ;;  %645 = vmatprep.mubr.f32.mxu1 (!%p247_p6), %v1724_v5 }
   0xf   : > { %1436 = vmatprep.subr.bf16.mxu1 (!%p247_p6), %v1435_v8  ;;  %1432 = vmatprep.subr.bf16.mxu0 (!%p247_p6), %v1431_v7  ;;  %v1443_v20 = vpack.c.bf16 (!%p247_p6), %v548_v18, %v546_v17  ;;  %v547_v22 = vld [vmem:[%s2323_s3 + $0x50] sm:$0xff] (!%p247_p6)  ;;  %v550_v24 = vld [vmem:[%s2323_s3 + $0x68] sm:$0xff] (!%p247_p6)  ;;  %v552_v25 = vld [vmem:[%s2323_s3 + $0x78] sm:$0xff] (!%p247_p6) }
  0x10   : > { %1438 = vmatpush1.bf16.msra.mxu1 (!%p247_p6), %v1437_v12  ;;  %v1445_v28 = vpack.c.bf16 (!%p247_p6), %v547_v22, %v545_v21  ;;  %v1447_v29 = vpack.c.bf16 (!%p247_p6), %v552_v25, %v550_v24  ;;  %v549_v30 = vld [vmem:[%s2323_s3 + $0x60] sm:$0xff] (!%p247_p6)  ;;  %v551_v31 = vld [vmem:[%s2323_s3 + $0x70] sm:$0xff] (!%p247_p6)  ;;  %v554_v32 = vld [vmem:[%s2323_s3 + $0x88] sm:$0xff] (!%p247_p6) }
  0x11   : > { %1440 = vmatprep.subr.bf16.mxu1 (!%p247_p6), %v1439_v16  ;;  %v556_v34 = vld [vmem:[%s2323_s3 + $0x98] sm:$0xff] (!%p247_p6)  ;;  %v1449_v36 = vpack.c.bf16 (!%p247_p6), %v551_v31, %v549_v30  ;;  %v553_v49 = vld [vmem:[%s2323_s3 + $0x80] sm:$0xff] (!%p247_p6)  ;;  %v555_v50 = vld [vmem:[%s2323_s3 + $0x90] sm:$0xff] (!%p247_p6) }
  0x12   : > { %s287_s12 = scalar_select %p286_p7, %s1804_s16, 24  ;;  %1434 = vmatpush3.bf16.msra.mxu0 %v1431_v7  ;;  %v1451_v37 = vpack.c.bf16 %v556_v34, %v554_v32  ;;  %v1453_v51 = vpack.c.bf16 %v555_v50, %v553_v49  ;;  %v558_v52 = vld [vmem:[%s2323_s3 + $0xa8] sm:$0xff]  ;;  %v560_v53 = vld [vmem:[%s2323_s3 + $0xb8] sm:$0xff]  ;;  %v557_v55 = vld [vmem:[%s2323_s3 + $0xa0] sm:$0xff] }
  0x13   : > { %v1455_v54 = vpack.c.bf16 %v560_v53, %v558_v52  ;;  %v559_v56 = vld [vmem:[%s2323_s3 + $0xb0] sm:$0xff]  ;;  %v562_v58 = vld [vmem:[%s2323_s3 + $0xc8] sm:$0xff]  ;;  %v564_v59 = vld [vmem:[%s2323_s3 + $0xd8] sm:$0xff]  ;;  %s983_s24 = ssub.s32 (%p1790_p4), 25, %s1804_s16  ;;  %s1292_s18 = sshll.u32 (%p1790_p4), %s1778_s27, 7 }
  0x14   : > { %s1256_s26 = sshll.u32 %s287_s12, 3  ;;  %1442 = vmatpush1.bf16.msra.mxu1 %v1441_v19  ;;  %v1457_v57 = vpack.c.bf16 %v559_v56, %v557_v55  ;;  %v1459_v60 = vpack.c.bf16 %v564_v59, %v562_v58  ;;  %v561_v61 = vld [vmem:[%s2323_s3 + $0xc0] sm:$0xff]  ;;  %v563_v62 = vld [vmem:[%s2323_s3 + $0xd0] sm:$0xff]  ;;  %v566_v0 = vld [vmem:[%s2323_s3 + $0xe8] sm:$0xff]  ;;  %p984_p8 = scmp.lt.s32.totalorder (%p1790_p4), %s983_s24, 16 }
  0x15   : > { %s1844_s10 = scalar_lea.vmem %s2320_s0, %s1256_s26  ;;  %1444 = vmatprep.subr.bf16.mxu1 %v1443_v20  ;;  %v1461_v63 = vpack.c.bf16 %v563_v62, %v561_v61  ;;  %v568_v1 = vld [vmem:[%s2323_s3 + $0xf8] sm:$0xff]  ;;  %v565_v2 = vld [vmem:[%s2323_s3 + $0xe0] sm:$0xff]  ;;  %v567_v4 = vld [vmem:[%s2323_s3 + $0xf0] sm:$0xff] }
  0x16   : > { %v300_v23 = vld [vmem:[%s1844_s10] sm:$0xff]  ;;  %v301_v26 = vld [vmem:[%s1844_s10 + $0x8] sm:$0xff]  ;;  %v302_v27 = vld [vmem:[%s1844_s10 + $0x10] sm:$0xff]  ;;  %v1463_v3 = vpack.c.bf16 %v568_v1, %v566_v0  ;;  %v1465_v6 = vpack.c.bf16 %v567_v4, %v565_v2 }
  0x17   : > { %1403 = vmatprep.mubr.msk.f32.mxu0 %vm327_vm0, %v300_v23  ;;  %v303_v33 = vld [vmem:[%s1844_s10 + $0x18] sm:$0xff]  ;;  %v304_v35 = vld [vmem:[%s1844_s10 + $0x20] sm:$0xff]  ;;  %v305_v38 = vld [vmem:[%s1844_s10 + $0x28] sm:$0xff] }
  0x18   : > { %1404 = vmatmul.mubr.msk.f32.vlgmr.msra.gmra.mrb[0].mxu0 %vm327_vm0, %v301_v26  ;;  %1446 = vmatpush1.bf16.msra.mxu1 %v1445_v28  ;;  %v306_v39 = vld [vmem:[%s1844_s10 + $0x30] sm:$0xff]  ;;  %v307_v40 = vld [vmem:[%s1844_s10 + $0x38] sm:$0xff]  ;;  %v308_v41 = vld [vmem:[%s1844_s10 + $0x40] sm:$0xff] }
  0x19   : > { %1406 = vmatprep.mubr.msk.f32.mxu0 %vm327_vm0, %v302_v27  ;;  %1448 = vmatprep.subr.bf16.mxu1 %v1447_v29  ;;  %v309_v42 = vld [vmem:[%s1844_s10 + $0x48] sm:$0xff]  ;;  %v310_v43 = vld [vmem:[%s1844_s10 + $0x50] sm:$0xff]  ;;  %v311_v44 = vld [vmem:[%s1844_s10 + $0x58] sm:$0xff] }
  0x1a   : > { %v312_v45 = vld [vmem:[%s1844_s10 + $0x60] sm:$0xff]  ;;  %v313_v46 = vld [vmem:[%s1844_s10 + $0x68] sm:$0xff]  ;;  %v314_v47 = vld [vmem:[%s1844_s10 + $0x70] sm:$0xff] }
  0x1b   : > { %v315_v48 = vld [vmem:[%s1844_s10 + $0x78] sm:$0xff]  ;;  %v790_v7 = vld [vmem:[%s2325_s5 + $0x80] sm:$0xff]  ;;  %v791_v8 = vld [vmem:[%s2325_s5 + $0x88] sm:$0xff]  ;;  %s2227_s10 = scalar_lea.vmem (%p1790_p4), %s2327_s7, %s1292_s18  }
  0x1c   : > { %1407 = vmatmul.mubr.msk.f32.gmra.mrb[2].mxu0 %vm327_vm0, %v303_v33  ;;  %1450 = vmatpush1.bf16.msra.mxu1 %v1449_v36  ;;  %v774_v9 = vld [vmem:[%s2325_s5] sm:$0xff]  ;;  %v1467_v10 = vpack.c.bf16 %v791_v8, %v790_v7  ;;  %v775_v11 = vld [vmem:[%s2325_s5 + $0x8] sm:$0xff]  ;;  %v792_v12 = vld [vmem:[%s2325_s5 + $0x90] sm:$0xff] }
  0x1d   : > { %1409 = vmatprep.mubr.msk.f32.mxu0 %vm327_vm0, %v304_v35  ;;  %1452 = vmatprep.subr.bf16.mxu1 %v1451_v37  ;;  %v793_v13 = vld [vmem:[%s2325_s5 + $0x98] sm:$0xff]  ;;  %v1963_v14 = vpack.c.bf16 %v775_v11, %v774_v9  ;;  %v776_v16 = vld [vmem:[%s2325_s5 + $0x10] sm:$0xff]  ;;  %v794_v18 = vld [vmem:[%s2325_s5 + $0xa0] sm:$0xff] }
  0x1e   : > { %v1965_v15 = vpack.c.bf16 %v793_v13, %v792_v12  ;;  %v777_v17 = vld [vmem:[%s2325_s5 + $0x18] sm:$0xff]  ;;  %1468 = vmatprep.subr.bf16.mxu0 %v1467_v10  ;;  %v795_v19 = vld [vmem:[%s2325_s5 + $0xa8] sm:$0xff]  ;;  %v778_v22 = vld [vmem:[%s2325_s5 + $0x20] sm:$0xff] }
  0x1f   : > { %1470 = vmatpush3.bf16.msra.mxu0 %v1963_v14  ;;  %v1980_v20 = vpack.c.bf16 %v777_v17, %v776_v16  ;;  %v1983_v21 = vpack.c.bf16 %v795_v19, %v794_v18  ;;  %v779_v23 = vld [vmem:[%s2325_s5 + $0x28] sm:$0xff]  ;;  %v796_v24 = vld [vmem:[%s2325_s5 + $0xb0] sm:$0xff]  ;;  %v797_v25 = vld [vmem:[%s2325_s5 + $0xb8] sm:$0xff] }
  0x20   : > { %1410 = vmatmul.mubr.msk.f32.gmra.mrb[4].mxu0 %vm327_vm0, %v305_v38  ;;  %1454 = vmatpush1.bf16.msra.mxu1 %v1453_v51  ;;  %v1998_v26 = vpack.c.bf16 %v779_v23, %v778_v22  ;;  %v2001_v27 = vpack.c.bf16 %v797_v25, %v796_v24  ;;  %v780_v28 = vld [vmem:[%s2325_s5 + $0x30] sm:$0xff]  ;;  %v781_v29 = vld [vmem:[%s2325_s5 + $0x38] sm:$0xff]  ;;  %v798_v30 = vld [vmem:[%s2325_s5 + $0xc0] sm:$0xff] }
  0x21   : > { %1412 = vmatprep.mubr.msk.f32.mxu0 %vm327_vm0, %v306_v39  ;;  %1456 = vmatprep.subr.bf16.mxu1 %v1455_v54  ;;  %v799_v31 = vld [vmem:[%s2325_s5 + $0xc8] sm:$0xff]  ;;  %v2016_v32 = vpack.c.bf16 %v781_v29, %v780_v28  ;;  %v782_v34 = vld [vmem:[%s2325_s5 + $0x40] sm:$0xff]  ;;  %v800_v36 = vld [vmem:[%s2325_s5 + $0xd0] sm:$0xff] }
  0x22   : > { %1472 = vmatprep.subr.bf16.mxu0 %v1965_v15  ;;  %v2019_v33 = vpack.c.bf16 %v799_v31, %v798_v30  ;;  %v783_v35 = vld [vmem:[%s2325_s5 + $0x48] sm:$0xff]  ;;  %v801_v37 = vld [vmem:[%s2325_s5 + $0xd8] sm:$0xff] }
  0x23   : > { %1474 = vmatpush3.bf16.msra.mxu0 %v1980_v20  ;;  %v2034_v38 = vpack.c.bf16 %v783_v35, %v782_v34  ;;  %v2037_v39 = vpack.c.bf16 %v801_v37, %v800_v36  ;;  %v804_v35 = vld [vmem:[%s2325_s5 + $0xf0] sm:$0xff] }
  0x24   : > { %1413 = vmatmul.mubr.msk.f32.gmra.mrb[6].mxu0 %vm327_vm0, %v307_v40  ;;  %1458 = vmatpush1.bf16.msra.mxu1 %v1457_v57  ;;  %v784_v40 = vld [vmem:[%s2325_s5 + $0x50] sm:$0xff] }
  0x25   : > { %1415 = vmatprep.mubr.msk.f32.mxu0 %vm327_vm0, %v308_v41  ;;  %1460 = vmatprep.subr.bf16.mxu1 %v1459_v60  ;;  %v785_v41 = vld [vmem:[%s2325_s5 + $0x58] sm:$0xff]  ;;  %v788_v37 = vld [vmem:[%s2325_s5 + $0x70] sm:$0xff] }
  0x26   : > { %1476 = vmatprep.subr.bf16.mxu0 %v1983_v21 }
  0x27   : > { %1478 = vmatpush3.bf16.msra.mxu0 %v1998_v26 }
  0x28   : > { %1416 = vmatmul.mubr.msk.f32.gmra.mrb[8].mxu0 %vm327_vm0, %v309_v42  ;;  %1462 = vmatpush1.bf16.msra.mxu1 %v1461_v63  ;;  %v802_v42 = vld [vmem:[%s2325_s5 + $0xe0] sm:$0xff] }
  0x29   : > { %1418 = vmatprep.mubr.msk.f32.mxu0 %vm327_vm0, %v310_v43  ;;  %1464 = vmatprep.subr.bf16.mxu1 %v1463_v3  ;;  %v803_v43 = vld [vmem:[%s2325_s5 + $0xe8] sm:$0xff] }
  0x2a   : > { %1480 = vmatprep.subr.bf16.mxu0 %v2001_v27 }
  0x2b   : > { %1482 = vmatpush3.bf16.msra.mxu0 %v2016_v32 }
  0x2c   : > { %1419 = vmatmul.mubr.msk.f32.gmra.mrb[10].mxu0 %vm327_vm0, %v311_v44  ;;  %1466 = vmatpush1.bf16.msra.mxu1 %v1465_v6  ;;  %v2052_v44 = vpack.c.bf16 %v785_v41, %v784_v40  ;;  %v571_v40 = vlaneseq }
  0x2d   : > { %1421 = vmatprep.mubr.msk.f32.mxu0 %vm327_vm0, %v312_v45  ;;  %1499 = vmatprep.subr.bf16.mxu1 %v1467_v10  ;;  %v2055_v45 = vpack.c.bf16 %v803_v43, %v802_v42  ;;  %v569_v43 = vld [vmem:[%s2324_s4] sm:$0x3] }
  0x2e   : > { %1484 = vmatprep.subr.bf16.mxu0 %v2019_v33  ;;  %v572_v41 = vshrl.u32 %v571_v40, 7 }
  0x2f   : > { %1486 = vmatpush3.bf16.msra.mxu0 %v2034_v38 }
  0x30   : > { %1422 = vmatmul.mubr.msk.f32.gmra.mrb[12].mxu0 %vm327_vm0, %v313_v46  ;;  %1488 = vmatprep.subr.bf16.mxu0 %v2037_v39  ;;  %v2062_v46 = vld [vmem:[%s2322_s2] ss:$0 sm:$0xff]  ;;  %v573_v42 = vsub.s32 0, %v572_v41 }
  0x31   : > { %1424 = vmatprep.mubr.msk.f32.mxu0 %vm327_vm0, %v314_v47 }
  0x33   : > { %1490 = vmatpush3.bf16.msra.mxu0 %v2052_v44 }
  0x34   : > { %1425 = vmatmul.mubr.msk.f32.gmra.mrb[14].mxu0 %vm327_vm0, %v315_v48  ;;  %1492 = vmatprep.subr.bf16.mxu0 %v2055_v45 }
  0xeb   : > { %v1405_v47 = vpop.f32.mrb[0].mxu0 }
  0xec   : > { %v442_v48 = vpop.f32.mrb[1].mxu0  ;;  %v448_v50 = vadd.f32 %v1405_v47, %v2062_v46 }
  0xed   : > { %v443_v49 = vadd.f32 %v2062_v46, %v442_v48 }
  0xef   : > { %1604 = vtanh.f32 %v443_v49  ;;  %v1408_v51 = vpop.f32.mrb[2].mxu0 }
  0xf0   : > { %v452_v52 = vpop.f32.mrb[3].mxu0  ;;  %1606 = vtanh.f32 %v448_v50  ;;  %v458_v56 = vadd.f32 %v1408_v51, %v2062_v46 }
  0xf1   : > { %v453_v53 = vadd.f32 %v2062_v46, %v452_v52 }
  0xf3   : > { %v1411_v54 = vpop.f32.mrb[4].mxu0  ;;  %1608 = vtanh.f32 %v453_v53 }
  0xf4   : > { %v462_v55 = vpop.f32.mrb[5].mxu0  ;;  %1610 = vtanh.f32 %v458_v56  ;;  %v468_v1 = vadd.f32 %v1411_v54, %v2062_v46 }
  0xf5   : > { %v463_v60 = vadd.f32 %v2062_v46, %v462_v55 }
  0xf7   : > { %v1414_v57 = vpop.f32.mrb[6].mxu0  ;;  %1612 = vtanh.f32 %v463_v60 }
  0xf8   : > { %v472_v58 = vpop.f32.mrb[7].mxu0  ;;  %1614 = vtanh.f32 %v468_v1  ;;  %v478_v10 = vadd.f32 %v1414_v57, %v2062_v46 }
  0xf9   : > { %v1605_v59 = vpop.eup %1604  ;;  %v473_v4 = vadd.f32 %v2062_v46, %v472_v58 }
  0xfa   : > { %646 = vmatmul.mubr.f32.vlgmr.msra.gmra.mrb[0].mxu1 %v1605_v59  ;;  %v1607_v63 = vpop.eup %1606 }
  0xfb   : > { %651 = vmatprep.mubr.f32.mxu1 %v1724_v5  ;;  %v1417_v61 = vpop.f32.mrb[8].mxu0  ;;  %1507 = vmatpush3.bf16.msra.mxu1 %v1963_v14  ;;  %1616 = vtanh.f32 %v473_v4 }
  0xfc   : > { %v482_v62 = vpop.f32.mrb[9].mxu0  ;;  %1500 = vmatprep.subr.bf16.mxu1 %v1965_v15  ;;  %1618 = vtanh.f32 %v478_v10  ;;  %v488_v16 = vadd.f32 %v1417_v61, %v2062_v46 }
  0xfd   : > { %v1609_v0 = vpop.eup %1608  ;;  %v483_v13 = vadd.f32 %v2062_v46, %v482_v62 }
  0xfe   : > { %652 = vmatmul.mubr.f32.gmra.mrb[2].mxu1 %v1607_v63  ;;  %v1611_v8 = vpop.eup %1610 }
  0xff   : > { %657 = vmatprep.mubr.f32.mxu1 %v1724_v5  ;;  %v1420_v2 = vpop.f32.mrb[10].mxu0  ;;  %1508 = vmatpush3.bf16.msra.mxu1 %v1980_v20  ;;  %1620 = vtanh.f32 %v483_v13 }
 0x100   : > { %v492_v3 = vpop.f32.mrb[11].mxu0  ;;  %1501 = vmatprep.subr.bf16.mxu1 %v1983_v21  ;;  %1622 = vtanh.f32 %v488_v16  ;;  %v498_v20 = vadd.f32 %v1420_v2, %v2062_v46 }
 0x101   : > { %v1613_v9 = vpop.eup %1612  ;;  %v493_v17 = vadd.f32 %v2062_v46, %v492_v3 }
 0x102   : > { %658 = vmatmul.mubr.f32.gmra.mrb[4].mxu1 %v1609_v0  ;;  %v1615_v14 = vpop.eup %1614 }
 0x103   : > { %663 = vmatprep.mubr.f32.mxu1 %v1724_v5  ;;  %v1423_v6 = vpop.f32.mrb[12].mxu0  ;;  %1509 = vmatpush3.bf16.msra.mxu1 %v1998_v26  ;;  %1624 = vtanh.f32 %v493_v17 }
 0x104   : > { %v502_v7 = vpop.f32.mrb[13].mxu0  ;;  %1502 = vmatprep.subr.bf16.mxu1 %v2001_v27  ;;  %1626 = vtanh.f32 %v498_v20  ;;  %v508_v24 = vadd.f32 %v1423_v6, %v2062_v46 }
 0x105   : > { %v1617_v15 = vpop.eup %1616  ;;  %v503_v21 = vadd.f32 %v2062_v46, %v502_v7 }
 0x106   : > { %664 = vmatmul.mubr.f32.gmra.mrb[6].mxu1 %v1611_v8  ;;  %v1619_v18 = vpop.eup %1618 }
 0x107   : > { %669 = vmatprep.mubr.f32.mxu1 %v1724_v5  ;;  %v1426_v11 = vpop.f32.mrb[14].mxu0  ;;  %1510 = vmatpush3.bf16.msra.mxu1 %v2016_v32  ;;  %1628 = vtanh.f32 %v503_v21  ;;  %v786_v32 = vld [vmem:[%s2325_s5 + $0x60] sm:$0xff] }
 0x108   : > { %v512_v12 = vpop.f32.mrb[15].mxu0  ;;  %1503 = vmatprep.subr.bf16.mxu1 %v2019_v33  ;;  %1630 = vtanh.f32 %v508_v24  ;;  %v518_v28 = vadd.f32 %v1426_v11, %v2062_v46  ;;  %v787_v33 = vld [vmem:[%s2325_s5 + $0x68] sm:$0xff] }
 0x109   : > { %v1621_v19 = vpop.eup %1620  ;;  %v513_v25 = vadd.f32 %v2062_v46, %v512_v12  ;;  %v1493_v34 = vpack.c.bf16 %v787_v33, %v786_v32 }
 0x10a   : > { %670 = vmatmul.mubr.f32.gmra.mrb[8].mxu1 %v1613_v9  ;;  %v1623_v22 = vpop.eup %1622 }
 0x10b   : > { %675 = vmatprep.mubr.f32.mxu1 %v1724_v5  ;;  %1511 = vmatpush3.bf16.msra.mxu1 %v2034_v38  ;;  %1632 = vtanh.f32 %v513_v25  ;;  %v789_v38 = vld [vmem:[%s2325_s5 + $0x78] sm:$0xff] }
 0x10c   : > { %1504 = vmatprep.subr.bf16.mxu1 %v2037_v39  ;;  %1634 = vtanh.f32 %v518_v28  ;;  %1494 = vmatpush3.bf16.msra.mxu0 %v1493_v34  ;;  %v1497_v39 = vpack.c.bf16 %v789_v38, %v788_v37 }
 0x10d   : > { %v1625_v23 = vpop.eup %1624 }
 0x10e   : > { %676 = vmatmul.mubr.f32.gmra.mrb[10].mxu1 %v1615_v14  ;;  %v1627_v26 = vpop.eup %1626 }
 0x10f   : > { %681 = vmatprep.mubr.f32.mxu1 %v1724_v5  ;;  %1512 = vmatpush3.bf16.msra.mxu1 %v2052_v44  ;;  %v577_v44 = vsub.s32 1, %v572_v41 }
 0x110   : > { %1505 = vmatprep.subr.bf16.mxu1 %v2055_v45  ;;  %v2128_v45 = vrot.slane %v569_v43, %v573_v42 }
 0x111   : > { %v1629_v27 = vpop.eup %1628  ;;  %v2130_v46 = vrot.slane %v569_v43, %v577_v44 }
 0x112   : > { %682 = vmatmul.mubr.f32.gmra.mrb[12].mxu1 %v1617_v15  ;;  %v1631_v29 = vpop.eup %1630 }
 0x113   : > { %687 = vmatprep.mubr.f32.mxu1 %v1724_v5  ;;  %1513 = vmatpush3.bf16.msra.mxu1 %v1493_v34 }
 0x115   : > { %v1633_v30 = vpop.eup %1632 }
 0x116   : > { %688 = vmatmul.mubr.f32.gmra.mrb[14].mxu1 %v1619_v18  ;;  %v1635_v31 = vpop.eup %1634 }
 0x117   : > { %693 = vmatprep.mubr.f32.mxu1 %v1724_v5 }
 0x11a   : > { %694 = vmatmul.mubr.f32.gmra.mrb[16].mxu1 %v1621_v19 }
 0x11b   : > { %699 = vmatprep.mubr.f32.mxu1 %v1724_v5 }
 0x11e   : > { %700 = vmatmul.mubr.f32.gmra.mrb[18].mxu1 %v1623_v22 }
 0x11f   : > { %705 = vmatprep.mubr.f32.mxu1 %v1724_v5 }
 0x122   : > { %706 = vmatmul.mubr.f32.gmra.mrb[20].mxu1 %v1625_v23 }
 0x123   : > { %711 = vmatprep.mubr.f32.mxu1 %v1724_v5 }
 0x126   : > { %712 = vmatmul.mubr.f32.gmra.mrb[22].mxu1 %v1627_v26 }
 0x127   : > { %717 = vmatprep.mubr.f32.mxu1 %v1724_v5 }
 0x12a   : > { %718 = vmatmul.mubr.f32.gmra.mrb[24].mxu1 %v1629_v27 }
 0x12b   : > { %723 = vmatprep.mubr.f32.mxu1 %v1724_v5 }
 0x12e   : > { %724 = vmatmul.mubr.f32.gmra.mrb[26].mxu1 %v1631_v29 }
 0x12f   : > { %729 = vmatprep.mubr.f32.mxu1 %v1724_v5 }
 0x132   : > { %730 = vmatmul.mubr.f32.gmra.mrb[28].mxu1 %v1633_v30 }
 0x133   : > { %735 = vmatprep.mubr.f32.mxu1 %v1724_v5  ;;  %v805_v5 = vld [vmem:[%s2325_s5 + $0xf8] sm:$0xff] }
 0x134   : > { %v1495_v36 = vpack.c.bf16 %v805_v5, %v804_v35 }
 0x136   : > { %736 = vmatmul.mubr.f32.gmra.mrb[30].mxu1 %v1635_v31  ;;  %1496 = vmatprep.subr.bf16.mxu0 %v1495_v36 }
 0x137   : > { %1506 = vmatprep.subr.bf16.mxu1 %v1495_v36  ;;  %1498 = vmatpush3.bf16.msra.mxu0 %v1497_v39 }
 0x138   : > { %1514 = vmatpush3.bf16.msra.mxu1 %v1497_v39 }
 0x1cd   : > { %v647_v47 = vpop.f32.mrb[0].mxu1 }
 0x1ce   : > { %v648_v48 = vadd.f32 %v647_v47, %v2128_v45  ;;  %v649_v49 = vpop.f32.mrb[1].mxu1 }
 0x1cf   : > { %v650_v50 = vadd.f32 %v649_v49, %v2130_v46 }
 0x1d0   : > { %v742_v53 = vmax.f32 %v648_v48, 0.0 }
 0x1d1   : > { %v743_v51 = vmax.f32 %v650_v50, 0.0  ;;  %v653_v52 = vpop.f32.mrb[2].mxu1 }
 0x1d2   : > { %v654_v54 = vadd.f32 %v653_v52, %v2128_v45  ;;  %v655_v55 = vpop.f32.mrb[3].mxu1 }
 0x1d3   : > { %v656_v56 = vadd.f32 %v655_v55, %v2130_v46  ;;  %877 = vmatprep.mubr.f32.mxu0 %v743_v51 }
 0x1d4   : > { %878 = vmatmul.mubr.f32.vlgmr.msra.gmra.mrb[16].mxu0 %v742_v53  ;;  %v744_v59 = vmax.f32 %v654_v54, 0.0 }
 0x1d5   : > { %v745_v57 = vmax.f32 %v656_v56, 0.0  ;;  %v659_v58 = vpop.f32.mrb[4].mxu1 }
 0x1d6   : > { %v660_v60 = vadd.f32 %v659_v58, %v2128_v45  ;;  %v661_v61 = vpop.f32.mrb[5].mxu1 }
 0x1d7   : > { %v662_v62 = vadd.f32 %v661_v61, %v2130_v46  ;;  %882 = vmatprep.mubr.f32.mxu0 %v745_v57 }
 0x1d8   : > { %883 = vmatmul.mubr.f32.gmra.mrb[18].mxu0 %v744_v59  ;;  %v746_v1 = vmax.f32 %v660_v60, 0.0 }
 0x1d9   : > { %v747_v63 = vmax.f32 %v662_v62, 0.0  ;;  %v665_v0 = vpop.f32.mrb[6].mxu1 }
 0x1da   : > { %v666_v2 = vadd.f32 %v665_v0, %v2128_v45  ;;  %v667_v3 = vpop.f32.mrb[7].mxu1 }
 0x1db   : > { %v668_v4 = vadd.f32 %v667_v3, %v2130_v46  ;;  %887 = vmatprep.mubr.f32.mxu0 %v747_v63 }
 0x1dc   : > { %888 = vmatmul.mubr.f32.gmra.mrb[20].mxu0 %v746_v1  ;;  %v748_v8 = vmax.f32 %v666_v2, 0.0 }
 0x1dd   : > { %v749_v6 = vmax.f32 %v668_v4, 0.0  ;;  %v671_v7 = vpop.f32.mrb[8].mxu1 }
 0x1de   : > { %v672_v9 = vadd.f32 %v671_v7, %v2128_v45  ;;  %v673_v10 = vpop.f32.mrb[9].mxu1 }
 0x1df   : > { %v674_v11 = vadd.f32 %v673_v10, %v2130_v46  ;;  %892 = vmatprep.mubr.f32.mxu0 %v749_v6 }
 0x1e0   : > { %893 = vmatmul.mubr.f32.gmra.mrb[22].mxu0 %v748_v8  ;;  %v750_v14 = vmax.f32 %v672_v9, 0.0 }
 0x1e1   : > { %v751_v12 = vmax.f32 %v674_v11, 0.0  ;;  %v677_v13 = vpop.f32.mrb[10].mxu1 }
 0x1e2   : > { %v678_v15 = vadd.f32 %v677_v13, %v2128_v45  ;;  %v679_v16 = vpop.f32.mrb[11].mxu1 }
 0x1e3   : > { %v680_v17 = vadd.f32 %v679_v16, %v2130_v46  ;;  %897 = vmatprep.mubr.f32.mxu0 %v751_v12 }
 0x1e4   : > { %898 = vmatmul.mubr.f32.gmra.mrb[24].mxu0 %v750_v14  ;;  %v752_v20 = vmax.f32 %v678_v15, 0.0 }
 0x1e5   : > { %v753_v18 = vmax.f32 %v680_v17, 0.0  ;;  %v683_v19 = vpop.f32.mrb[12].mxu1 }
 0x1e6   : > { %v684_v21 = vadd.f32 %v683_v19, %v2128_v45  ;;  %v685_v22 = vpop.f32.mrb[13].mxu1  ;;  %v2168_v19 = vld [vmem:[%s2326_s6] ss:$0 sm:$0xff] }
 0x1e7   : > { %v686_v23 = vadd.f32 %v685_v22, %v2130_v46  ;;  %902 = vmatprep.mubr.f32.mxu0 %v753_v18 }
 0x1e8   : > { %903 = vmatmul.mubr.f32.gmra.mrb[26].mxu0 %v752_v20  ;;  %v754_v26 = vmax.f32 %v684_v21, 0.0 }
 0x1e9   : > { %v755_v24 = vmax.f32 %v686_v23, 0.0  ;;  %v689_v25 = vpop.f32.mrb[14].mxu1 }
 0x1ea   : > { %v690_v27 = vadd.f32 %v689_v25, %v2128_v45  ;;  %v691_v28 = vpop.f32.mrb[15].mxu1 }
 0x1eb   : > { %v692_v29 = vadd.f32 %v691_v28, %v2130_v46  ;;  %907 = vmatprep.mubr.f32.mxu0 %v755_v24 }
 0x1ec   : > { %908 = vmatmul.mubr.f32.gmra.mrb[28].mxu0 %v754_v26  ;;  %v756_v32 = vmax.f32 %v690_v27, 0.0 }
 0x1ed   : > { %v757_v30 = vmax.f32 %v692_v29, 0.0  ;;  %v695_v31 = vpop.f32.mrb[16].mxu1 }
 0x1ee   : > { %v696_v33 = vadd.f32 %v695_v31, %v2128_v45  ;;  %v697_v34 = vpop.f32.mrb[17].mxu1 }
 0x1ef   : > { %v698_v35 = vadd.f32 %v697_v34, %v2130_v46  ;;  %912 = vmatprep.mubr.f32.mxu0 %v757_v30 }
 0x1f0   : > { %913 = vmatmul.mubr.f32.gmra.mrb[30].mxu0 %v756_v32  ;;  %v758_v37 = vmax.f32 %v696_v33, 0.0 }
 0x1f1   : > { %v759_v5 = vmax.f32 %v698_v35, 0.0  ;;  %v701_v36 = vpop.f32.mrb[18].mxu1 }
 0x1f2   : > { %v702_v38 = vadd.f32 %v701_v36, %v2128_v45  ;;  %v703_v39 = vpop.f32.mrb[19].mxu1 }
 0x1f3   : > { %v704_v40 = vadd.f32 %v703_v39, %v2130_v46  ;;  %917 = vmatprep.mubr.f32.mxu0 %v759_v5 }
 0x1f4   : > { %918 = vmatmul.mubr.f32.gmra.mrb[32].mxu0 %v758_v37  ;;  %v760_v43 = vmax.f32 %v702_v38, 0.0 }
 0x1f5   : > { %v761_v41 = vmax.f32 %v704_v40, 0.0  ;;  %v707_v42 = vpop.f32.mrb[20].mxu1 }
 0x1f6   : > { %v708_v44 = vadd.f32 %v707_v42, %v2128_v45  ;;  %v709_v47 = vpop.f32.mrb[21].mxu1 }
 0x1f7   : > { %v710_v48 = vadd.f32 %v709_v47, %v2130_v46  ;;  %922 = vmatprep.mubr.f32.mxu0 %v761_v41 }
 0x1f8   : > { %923 = vmatmul.mubr.f32.gmra.mrb[34].mxu0 %v760_v43  ;;  %v762_v51 = vmax.f32 %v708_v44, 0.0 }
 0x1f9   : > { %v763_v49 = vmax.f32 %v710_v48, 0.0  ;;  %v713_v50 = vpop.f32.mrb[22].mxu1 }
 0x1fa   : > { %v714_v52 = vadd.f32 %v713_v50, %v2128_v45  ;;  %v715_v53 = vpop.f32.mrb[23].mxu1 }
 0x1fb   : > { %v716_v54 = vadd.f32 %v715_v53, %v2130_v46  ;;  %927 = vmatprep.mubr.f32.mxu0 %v763_v49 }
 0x1fc   : > { %928 = vmatmul.mubr.f32.gmra.mrb[36].mxu0 %v762_v51  ;;  %v764_v57 = vmax.f32 %v714_v52, 0.0 }
 0x1fd   : > { %v765_v55 = vmax.f32 %v716_v54, 0.0  ;;  %v719_v56 = vpop.f32.mrb[24].mxu1 }
 0x1fe   : > { %v720_v58 = vadd.f32 %v719_v56, %v2128_v45  ;;  %v721_v59 = vpop.f32.mrb[25].mxu1 }
 0x1ff   : > { %v722_v60 = vadd.f32 %v721_v59, %v2130_v46  ;;  %932 = vmatprep.mubr.f32.mxu0 %v765_v55 }
 0x200   : > { %933 = vmatmul.mubr.f32.gmra.mrb[38].mxu0 %v764_v57  ;;  %v766_v63 = vmax.f32 %v720_v58, 0.0 }
 0x201   : > { %v767_v61 = vmax.f32 %v722_v60, 0.0  ;;  %v725_v62 = vpop.f32.mrb[26].mxu1 }
 0x202   : > { %v726_v0 = vadd.f32 %v725_v62, %v2128_v45  ;;  %v727_v1 = vpop.f32.mrb[27].mxu1 }
 0x203   : > { %v728_v2 = vadd.f32 %v727_v1, %v2130_v46  ;;  %937 = vmatprep.mubr.f32.mxu0 %v767_v61 }
 0x204   : > { %938 = vmatmul.mubr.f32.gmra.mrb[40].mxu0 %v766_v63  ;;  %v768_v6 = vmax.f32 %v726_v0, 0.0 }
 0x205   : > { %v769_v3 = vmax.f32 %v728_v2, 0.0  ;;  %v731_v4 = vpop.f32.mrb[28].mxu1 }
 0x206   : > { %v732_v7 = vadd.f32 %v731_v4, %v2128_v45  ;;  %v733_v8 = vpop.f32.mrb[29].mxu1 }
 0x207   : > { %v734_v9 = vadd.f32 %v733_v8, %v2130_v46  ;;  %942 = vmatprep.mubr.f32.mxu0 %v769_v3 }
 0x208   : > { %943 = vmatmul.mubr.f32.gmra.mrb[42].mxu0 %v768_v6  ;;  %v770_v12 = vmax.f32 %v732_v7, 0.0 }
 0x209   : > { %v771_v10 = vmax.f32 %v734_v9, 0.0  ;;  %v737_v11 = vpop.f32.mrb[30].mxu1 }
 0x20a   : > { %v738_v13 = vadd.f32 %v737_v11, %v2128_v45  ;;  %v739_v14 = vpop.f32.mrb[31].mxu1 }
 0x20b   : > { %v740_v15 = vadd.f32 %v739_v14, %v2130_v46  ;;  %947 = vmatprep.mubr.f32.mxu0 %v771_v10 }
 0x20c   : > { %948 = vmatmul.mubr.f32.gmra.mrb[44].mxu0 %v770_v12  ;;  %v772_v17 = vmax.f32 %v738_v13, 0.0 }
 0x20d   : > { %v773_v16 = vmax.f32 %v740_v15, 0.0 }
 0x20f   : > { %952 = vmatprep.mubr.f32.mxu1 %v773_v16 }
 0x210   : > { %953 = vmatmul.mubr.f32.vlgmr.msra.gmra.mrb[32].mxu1 %v772_v17 }
 0x2a7   : > { %v1347_v18 = vpop.f32.mrb[16].mxu0 }
 0x2a8   : > { %v1348_v20 = vpop.f32.mrb[17].mxu0 }
 0x2a9   : > { %v1349_v21 = vadd.f32 %v1348_v20, %v1347_v18 }
 0x2ab   : > { %v880_v45 = vadd.f32 %v1349_v21, %v2168_v19  ;;  %v1350_v46 = vpop.f32.mrb[18].mxu0 }
 0x2ac   : > { %v1351_v22 = vpop.f32.mrb[19].mxu0 }
 0x2ad   : > { %959 = vst.msk [vmem:[%s2171_s17] sm:$0xff] %vm958_vm1, %v880_v45  ;;  %v1352_v23 = vadd.f32 %v1351_v22, %v1350_v46 }
 0x2af   : > { %v885_v24 = vadd.f32 %v1352_v23, %v2168_v19  ;;  %v1353_v25 = vpop.f32.mrb[20].mxu0 }
 0x2b0   : > { %v1354_v26 = vpop.f32.mrb[21].mxu0 }
 0x2b1   : > { %960 = vst.msk [vmem:[%s2171_s17 + $0x8] sm:$0xff] %vm958_vm1, %v885_v24  ;;  %v1355_v27 = vadd.f32 %v1354_v26, %v1353_v25 }
 0x2b3   : > { %v890_v28 = vadd.f32 %v1355_v27, %v2168_v19  ;;  %v1356_v29 = vpop.f32.mrb[22].mxu0 }
 0x2b4   : > { %v1357_v30 = vpop.f32.mrb[23].mxu0 }
 0x2b5   : > { %961 = vst.msk [vmem:[%s2171_s17 + $0x10] sm:$0xff] %vm958_vm1, %v890_v28  ;;  %v1358_v31 = vadd.f32 %v1357_v30, %v1356_v29 }
 0x2b7   : > { %v895_v32 = vadd.f32 %v1358_v31, %v2168_v19  ;;  %v1359_v33 = vpop.f32.mrb[24].mxu0 }
 0x2b8   : > { %v1360_v34 = vpop.f32.mrb[25].mxu0 }
 0x2b9   : > { %962 = vst.msk [vmem:[%s2171_s17 + $0x18] sm:$0xff] %vm958_vm1, %v895_v32  ;;  %v1361_v35 = vadd.f32 %v1360_v34, %v1359_v33 }
 0x2bb   : > { %v900_v5 = vadd.f32 %v1361_v35, %v2168_v19  ;;  %v1362_v36 = vpop.f32.mrb[26].mxu0 }
 0x2bc   : > { %v1363_v37 = vpop.f32.mrb[27].mxu0 }
 0x2bd   : > { %963 = vst.msk [vmem:[%s2171_s17 + $0x20] sm:$0xff] %vm958_vm1, %v900_v5  ;;  %v1364_v38 = vadd.f32 %v1363_v37, %v1362_v36 }
 0x2bf   : > { %v905_v39 = vadd.f32 %v1364_v38, %v2168_v19  ;;  %v1365_v40 = vpop.f32.mrb[28].mxu0 }
 0x2c0   : > { %v1366_v41 = vpop.f32.mrb[29].mxu0 }
 0x2c1   : > { %964 = vst.msk [vmem:[%s2171_s17 + $0x28] sm:$0xff] %vm958_vm1, %v905_v39  ;;  %v1367_v42 = vadd.f32 %v1366_v41, %v1365_v40 }
 0x2c3   : > { %v910_v43 = vadd.f32 %v1367_v42, %v2168_v19  ;;  %v1368_v44 = vpop.f32.mrb[30].mxu0 }
 0x2c4   : > { %v1369_v47 = vpop.f32.mrb[31].mxu0 }
 0x2c5   : > { %965 = vst.msk [vmem:[%s2171_s17 + $0x30] sm:$0xff] %vm958_vm1, %v910_v43  ;;  %v1370_v48 = vadd.f32 %v1369_v47, %v1368_v44 }
 0x2c7   : > { %v915_v49 = vadd.f32 %v1370_v48, %v2168_v19  ;;  %v1371_v50 = vpop.f32.mrb[32].mxu0 }
 0x2c8   : > { %v1372_v51 = vpop.f32.mrb[33].mxu0 }
 0x2c9   : > { %966 = vst.msk [vmem:[%s2171_s17 + $0x38] sm:$0xff] %vm958_vm1, %v915_v49  ;;  %v1373_v52 = vadd.f32 %v1372_v51, %v1371_v50 }
 0x2cb   : > { %v920_v53 = vadd.f32 %v1373_v52, %v2168_v19  ;;  %v1374_v54 = vpop.f32.mrb[34].mxu0 }
 0x2cc   : > { %v1375_v55 = vpop.f32.mrb[35].mxu0 }
 0x2cd   : > { %967 = vst.msk [vmem:[%s2171_s17 + $0x40] sm:$0xff] %vm958_vm1, %v920_v53  ;;  %v1376_v56 = vadd.f32 %v1375_v55, %v1374_v54 }
 0x2cf   : > { %v925_v57 = vadd.f32 %v1376_v56, %v2168_v19  ;;  %v1377_v58 = vpop.f32.mrb[36].mxu0 }
 0x2d0   : > { %v1378_v59 = vpop.f32.mrb[37].mxu0 }
 0x2d1   : > { %968 = vst.msk [vmem:[%s2171_s17 + $0x48] sm:$0xff] %vm958_vm1, %v925_v57  ;;  %v1379_v60 = vadd.f32 %v1378_v59, %v1377_v58 }
 0x2d3   : > { %v930_v61 = vadd.f32 %v1379_v60, %v2168_v19  ;;  %v1380_v62 = vpop.f32.mrb[38].mxu0 }
 0x2d4   : > { %v1381_v63 = vpop.f32.mrb[39].mxu0 }
 0x2d5   : > { %969 = vst.msk [vmem:[%s2171_s17 + $0x50] sm:$0xff] %vm958_vm1, %v930_v61  ;;  %v1382_v0 = vadd.f32 %v1381_v63, %v1380_v62 }
 0x2d7   : > { %v935_v1 = vadd.f32 %v1382_v0, %v2168_v19  ;;  %v1383_v2 = vpop.f32.mrb[40].mxu0 }
 0x2d8   : > { %v1384_v3 = vpop.f32.mrb[41].mxu0 }
 0x2d9   : > { %970 = vst.msk [vmem:[%s2171_s17 + $0x58] sm:$0xff] %vm958_vm1, %v935_v1  ;;  %v1385_v4 = vadd.f32 %v1384_v3, %v1383_v2 }
 0x2db   : > { %v940_v6 = vadd.f32 %v1385_v4, %v2168_v19  ;;  %v1386_v7 = vpop.f32.mrb[42].mxu0 }
 0x2dc   : > { %v1387_v8 = vpop.f32.mrb[43].mxu0 }
 0x2dd   : > { %971 = vst.msk [vmem:[%s2171_s17 + $0x60] sm:$0xff] %vm958_vm1, %v940_v6  ;;  %v1388_v9 = vadd.f32 %v1387_v8, %v1386_v7 }
 0x2df   : > { %v945_v10 = vadd.f32 %v1388_v9, %v2168_v19  ;;  %v1389_v11 = vpop.f32.mrb[44].mxu0 }
 0x2e0   : > { %v1390_v12 = vpop.f32.mrb[45].mxu0 }
 0x2e1   : > { %972 = vst.msk [vmem:[%s2171_s17 + $0x68] sm:$0xff] %vm958_vm1, %v945_v10  ;;  %v1391_v13 = vadd.f32 %v1390_v12, %v1389_v11 }
 0x2e3   : > { %v950_v14 = vadd.f32 %v1391_v13, %v2168_v19  ;;  %v1392_v15 = vpop.f32.mrb[32].mxu1  ;;  %981 = sbr.rel (!%p1790_p4) target bundleno = 795 (0x31b), region = 52 }
 0x2e4   : > { %v1393_v16 = vpop.f32.mrb[33].mxu1 }
 0x2e5   : > { %973 = vst.msk [vmem:[%s2171_s17 + $0x70] sm:$0xff] %vm958_vm1, %v950_v14  ;;  %v1394_v17 = vadd.f32 %v1393_v16, %v1392_v15 }
 0x2e7   : > { %v955_v18 = vadd.f32 %v1394_v17, %v2168_v19 }
 0x2e9   : > { %974 = vst.msk [vmem:[%s2171_s17 + $0x78] sm:$0xff] %vm958_vm1, %v955_v18 }
 0x2ea   : > { %s2336_s24 = smov (!%p984_p8, %s983_s24), 16 }
 0x2eb   : > { %s1277_s21 = sshll.u32 %s2336_s24, 7 }
 0x2ec   : > { %p1280_p9 = scmp.eq.s32.totalorder %s1277_s21, 0 }
 0x2ed   : > { %s2233_s22 = sshrl.u32 (!%p1280_p9), %s2336_s24, 4 }
 0x2ee   : > { %992 = sbr.rel (%p1280_p9) target bundleno = 795 (0x31b), region = 56  ;;  %p1281_p10 = scmp.le.s32.totalorder (!%p1280_p9), %s2233_s22, 0 }
 0x2f5   : > { %1206 = sbr.rel (%p1281_p10) target bundleno = 774 (0x306), region = 132  ;;  %s2329_s27 = smov (!%p1281_p10), %s2227_s10 }
 0x2f6   : > { %s2330_s9 = smov (!%p1281_p10), %s2171_s17  ;;  %s2242_s16 = smov (!%p1281_p10), 0  }
 0x2f7   : > { %s2244_s23 = smov (!%p1281_p10), 0  }
 0x2fc LB: >> { %v1084_v19 = vld [vmem:[%s1698_s9] sm:$0xff]  ;;  %v1086_v20 = vld [vmem:[%s1698_s9 + $0x8] sm:$0xff]  ;;  %v1088_v21 = vld [vmem:[%s1698_s9 + $0x10] sm:$0xff]  ;;  %s1116_s26 = sadd.s32 1, %s1702_s16  ;;  %s1078_s23 = sadd.s32 1, %s1706_s23   ;;  %s1706_s23 = sphi %s2244_s23, %s1078_s23   ;;  %s1702_s16 = sphi %s2242_s16, %s2331_s16   ;;  %s1698_s9 = sphi %s2330_s9, %s1121_s9   ;;  %s1694_s27 = sphi %s2329_s27, %s1122_s27  }
 0x2fd   : >> { %1085 = vst [vmem:[%s1694_s27] sm:$0xff] %v1084_v19  ;;  %1087 = vst [vmem:[%s1694_s27 + $0x8] sm:$0xff] %v1086_v20  ;;  %v1090_v45 = vld [vmem:[%s1698_s9 + $0x18] sm:$0xff]  ;;  %v1092_v46 = vld [vmem:[%s1698_s9 + $0x20] sm:$0xff]  ;;  %p1117_p11 = scmp.ge.s32.totalorder %s1116_s26, %s2233_s22  ;;  %p1077_p12 = scmp.ge.s32.totalorder %s1078_s23, %s2233_s22 }
 0x2fe   : >> { %1089 = vst [vmem:[%s1694_s27 + $0x10] sm:$0xff] %v1088_v21  ;;  %v1094_v22 = vld [vmem:[%s1698_s9 + $0x28] sm:$0xff]  ;;  %1091 = vst [vmem:[%s1694_s27 + $0x18] sm:$0xff] %v1090_v45  ;;  %v1096_v23 = vld [vmem:[%s1698_s9 + $0x30] sm:$0xff] }
 0x2ff   : >> { %1093 = vst [vmem:[%s1694_s27 + $0x20] sm:$0xff] %v1092_v46  ;;  %1095 = vst [vmem:[%s1694_s27 + $0x28] sm:$0xff] %v1094_v22  ;;  %v1098_v24 = vld [vmem:[%s1698_s9 + $0x38] sm:$0xff]  ;;  %v1100_v25 = vld [vmem:[%s1698_s9 + $0x40] sm:$0xff]  ;;  %s2338_s26 = smov (%p1117_p11, %s1116_s26), 0  ;;  %1080 = sbr.rel (!%p1077_p12) target bundleno = 764 (0x2fc), region = 138 }
 0x300   : >> { %1097 = vst [vmem:[%s1694_s27 + $0x30] sm:$0xff] %v1096_v23  ;;  %1099 = vst [vmem:[%s1694_s27 + $0x38] sm:$0xff] %v1098_v24  ;;  %v1102_v26 = vld [vmem:[%s1698_s9 + $0x48] sm:$0xff]  ;;  %v1104_v27 = vld [vmem:[%s1698_s9 + $0x50] sm:$0xff]  ;;  %s1282_s29 = sshll.u32 %s2338_s26, 7  ;;  %s2331_s16 = smov %s2338_s26 }
 0x301   : >> { %1101 = vst [vmem:[%s1694_s27 + $0x40] sm:$0xff] %v1100_v25  ;;  %v1106_v28 = vld [vmem:[%s1698_s9 + $0x58] sm:$0xff]  ;;  %1103 = vst [vmem:[%s1694_s27 + $0x48] sm:$0xff] %v1102_v26  ;;  %v1108_v29 = vld [vmem:[%s1698_s9 + $0x60] sm:$0xff] }
 0x302   : >> { %1105 = vst [vmem:[%s1694_s27 + $0x50] sm:$0xff] %v1104_v27  ;;  %1107 = vst [vmem:[%s1694_s27 + $0x58] sm:$0xff] %v1106_v28  ;;  %v1110_v30 = vld [vmem:[%s1698_s9 + $0x68] sm:$0xff]  ;;  %v1112_v31 = vld [vmem:[%s1698_s9 + $0x70] sm:$0xff] }
 0x303   : >> { %1109 = vst [vmem:[%s1694_s27 + $0x60] sm:$0xff] %v1108_v29  ;;  %1111 = vst [vmem:[%s1694_s27 + $0x68] sm:$0xff] %v1110_v30  ;;  %v1114_v32 = vld [vmem:[%s1698_s9 + $0x78] sm:$0xff]  ;;  %s1121_s9 = scalar_lea.vmem %s2171_s17, %s1282_s29 [#allocation2]  }
 0x304   : >> { %1113 = vst [vmem:[%s1694_s27 + $0x70] sm:$0xff] %v1112_v31  ;;  %1115 = vst [vmem:[%s1694_s27 + $0x78] sm:$0xff] %v1114_v32  ;;  %s1122_s27 = scalar_lea.vmem %s2227_s10, %s1282_s29  }
 0x306 PF: > { %s2302_s30 = sand.u32 15, %s2336_s24   ;;  %s1293_s11 = sshll.u32 %s2233_s22, 7 }
 0x307   : > { %s1127_s13 = scalar_lea.vmem %s2171_s17, %s1293_s11 [#allocation2]   ;;  %s1129_s14 = scalar_lea.vmem %s2227_s10, %s1293_s11  }
 0x308   : > { %p1287_p13 = scmp.le.s32.totalorder %s2302_s30, 0 }
 0x309   : > { %s1708_s15 = smov (!%p1287_p13), %s1129_s14   ;;  %s1712_s12 = smov (!%p1287_p13), %s1127_s13  }
 0x30a   : > { %1220 = sbr.rel (%p1287_p13) target bundleno = 795 (0x31b), region = 143  ;;  %s1716_s18 = smov (!%p1287_p13), 0  }
 0x30b   : > { %s1720_s19 = smov (!%p1287_p13), 0  }
 0x311 LB: >> { %v1139_v33 = vld [vmem:[%s1714_s12] sm:$0xff]  ;;  %s1141_s24 = sadd.s32 1, %s1718_s18  ;;  %s1133_s19 = sadd.s32 1, %s1722_s19   ;;  %s1722_s19 = sphi %s1720_s19, %s1133_s19   ;;  %s1718_s18 = sphi %s1716_s18, %s1717_s18   ;;  %s1714_s12 = sphi %s1712_s12, %s1146_s12   ;;  %s1710_s15 = sphi %s1708_s15, %s1147_s15  }
 0x312   : >> { %1140 = vst [vmem:[%s1710_s15] sm:$0xff] %v1139_v33  ;;  %p1142_p0 = scmp.ge.s32.totalorder %s1141_s24, %s2302_s30  ;;  %p1132_p1 = scmp.ge.s32.totalorder %s1133_s19, %s2302_s30 }
 0x314   : >> { %s2340_s24 = smov (%p1142_p0, %s1141_s24), 0  ;;  %1135 = sbr.rel (!%p1132_p1) target bundleno = 785 (0x311), region = 149 }
 0x315   : >> { %s1288_s17 = sshll.u32 %s2340_s24, 3  ;;  %s1717_s18 = smov %s2340_s24  }
 0x316   : >> { %s1146_s12 = scalar_lea.vmem %s1127_s13, %s1288_s17 [#allocation2]   ;;  %s1147_s15 = scalar_lea.vmem %s1129_s14, %s1288_s17  }
 0x31b PF: > { %p14_p2 = scmp.ge.s32.totalorder %s1780_s28, 4   ;;  %s2332_s24 = smov %s1686_s25 }
 0x31c   : > { %s2333_s25 = smov %s1788_s8  ;;  %s2334_s26 = smov %s1780_s28 }
 0x31d   :  { %16 = sbr.rel (!%p14_p2) target bundleno = 2 (0x2), region = 160 }

</bundles_post_ra>
